<compile_context>
chip_gen: v7x
topology: tpu7x:2x2x1
jax: 0.10.0
libtpu: 0.0.40
codegen_flags: <defaults>
</compile_context>

<pallas_src>
import math
import jax
import jax.numpy as jnp
from jax.experimental import pallas as pl
from jax.experimental.pallas import tpu as pltpu


_LN_EPS = 1e-5  # PyTorch F.layer_norm default eps


def _layer_norm_f32(x):
    """F.layer_norm over the last dim, no affine, biased variance, f32 math.

    Two-moment form: one pass computes sum(x) and sum(x*x); the two XLU row
    reductions issue back-to-back and we skip a second full-tile VPU pass.
    """
    n = x.shape[-1]
    s1 = jnp.sum(x, axis=-1, keepdims=True)
    s2 = jnp.sum(x * x, axis=-1, keepdims=True)
    mu = s1 * (1.0 / n)
    var = jnp.maximum(s2 * (1.0 / n) - mu * mu, 0.0)   # guard tiny negative rounding
    return (x - mu) * jax.lax.rsqrt(var + _LN_EPS)


# ----------------------------- Pallas kernel --------------------------------

def _actor_kernel(x_ref, w1_ref, b1_ref, w2_ref, b2_ref, wm_ref, bm_ref, mean_ref):
    # trick['feature_norm'] : layer-norm over the observation dim (f32 math)
    x = _layer_norm_f32(x_ref[...].astype(jnp.float32))

    # h = relu(l1(x)); layer_norm   (bf16 MXU operands, f32 accumulation)
    h = jnp.dot(x.astype(w1_ref.dtype), w1_ref[...],
                preferred_element_type=jnp.float32) + b1_ref[...]
    h = _layer_norm_f32(jnp.maximum(h, 0.0))

    # h = relu(l2(h)); layer_norm
    h = jnp.dot(h.astype(w2_ref.dtype), w2_ref[...],
                preferred_element_type=jnp.float32) + b2_ref[...]
    h = _layer_norm_f32(jnp.maximum(h, 0.0))

    # mean = tanh(mean_layer(h)) -- bf16 operands, f32 accumulation, single MXU pass
    mean = jnp.dot(h.astype(wm_ref.dtype), wm_ref[...],
                   preferred_element_type=jnp.float32) + bm_ref[...]
    mean_ref[...] = jnp.tanh(mean)

    # std is batch-independent and is computed in the wrapper (no per-tile output).


# ------------------------------- wrapper -------------------------------------

def _round_up(x, m):
    return (x + m - 1) // m * m


def actor_forward(x, params, *, block_b=1024, matmul_dtype=jnp.bfloat16):
    """x: (B, obs_dim) f32; params: dict of weights/biases (W stored as (in, out)).

    Returns (mean, std) with the PyTorch Actor.forward semantics.
    """
    x = x.astype(jnp.float32)
    B, D = x.shape
    w1 = params["w1"].astype(matmul_dtype)
    b1 = params["b1"].astype(jnp.float32)
    w2 = params["w2"].astype(matmul_dtype)
    b2 = params["b2"].astype(jnp.float32)
    wm = params["wm"].astype(matmul_dtype)
    bm = params["bm"].astype(jnp.float32)
    H1, H2, A = w1.shape[1], w2.shape[1], wm.shape[1]

    # Batch tile:
    #  * multiple of 16 so bf16 MXU operands fill packed (16,128) vregs,
    #  * at least 2 grid steps whenever B allows it, so the "parallel" grid axis
    #    actually shards across both v7x TensorCores (the extra pipeline step costs
    #    only ~0.35 us on single-TC chips),
    #  * capped at block_b (default 1024) -- large tiles amortize per-step overhead
    #    on v5e/v6e while staying ~4 MiB of VMEM (lane-padded narrow blocks).
    Bp16 = _round_up(B, 16)
    if Bp16 >= 32:
        TB = min(block_b, _round_up(pl.cdiv(Bp16, 2), 16))
    else:
        TB = Bp16
    Bp = _round_up(B, TB)
    if Bp != B:
        # Padded rows are zeros; LayerNorm / matmul on them is finite and the rows
        # are sliced away after the call (row-wise independent math).
        x = jnp.pad(x, ((0, Bp - B), (0, 0)))
    grid = (Bp // TB,)

    tile = lambda shape: pl.BlockSpec(shape, lambda i: (i, 0))          # batch-tiled
    resident = lambda shape: pl.BlockSpec(shape, lambda i: (0, 0))      # stays in VMEM

    cost = pl.CostEstimate(
        flops=2 * Bp * (D * H1 + H1 * H2 + H2 * A) + 10 * Bp * (D + H1 + H2),
        transcendentals=Bp * (3 + A),                       # 3 rsqrt/row + tanh head
        bytes_accessed=4 * Bp * (D + A) + 2 * (D * H1 + H1 * H2 + H2 * A)
                       + 4 * (H1 + H2 + A),
    )

    mean = pl.pallas_call(
        _actor_kernel,
        out_shape=jax.ShapeDtypeStruct((Bp, A), jnp.float32),
        grid=grid,
        in_specs=[
            tile((TB, D)),
            resident((D, H1)), resident((1, H1)),
            resident((H1, H2)), resident((1, H2)),
            resident((H2, A)), resident((1, A)),
        ],
        out_specs=tile((TB, A)),
        compiler_params=pltpu.CompilerParams(
            dimension_semantics=("parallel",),      # megacore sharding on v7x
            vmem_limit_bytes=32 * 1024 * 1024,      # headroom for larger block_b (v5e)
        ),
        cost_estimate=cost,
    )(x, w1, b1, w2, b2, wm, bm)

    # std = exp(clamp(log_std, -20, 2)) is batch-independent: compute once here and
    # broadcast lazily instead of writing identical rows from every kernel tile.
    std_row = jnp.exp(jnp.clip(params["log_std"].astype(jnp.float32), -20.0, 2.0))
    std = jnp.broadcast_to(std_row, (B, A))

    return mean[:B], std


# -------------------------- deterministic init ------------------------------

def _orthogonal_t(key, out_dim, in_dim, gain):
    """nn.init.orthogonal_ on a (out, in) weight, returned transposed (in, out)."""
    w = jax.nn.initializers.orthogonal(scale=gain)(key, (out_dim, in_dim), jnp.float32)
    return w.T


def make_params(key, obs_dim, action_dim, hidden_1=128, hidden_2=128):
    k1, k2, k3 = jax.random.split(key, 3)
    gain = math.sqrt(2.0)  # nn.init.calculate_gain('relu')
    return {
        "w1": _orthogonal_t(k1, hidden_1, obs_dim, gain),
        "b1": jnp.zeros((1, hidden_1), jnp.float32),
        "w2": _orthogonal_t(k2, hidden_2, hidden_1, gain),
        "b2": jnp.zeros((1, hidden_2), jnp.float32),
        "wm": _orthogonal_t(k3, action_dim, hidden_2, 0.01),  # output head gain=0.01
        "bm": jnp.zeros((1, action_dim), jnp.float32),
        "log_std": jnp.zeros((1, action_dim), jnp.float32),
    }


# ------------------------------- reference -----------------------------------

def _reference(x, params, matmul_dtype=jnp.bfloat16):
    """Plain-JAX forward with the same dtype policy as the kernel.

    NOTE: l1/l2/mean_layer use bf16 operands with f32 accumulation (not strictly
    identical to the f32 PyTorch module); pass matmul_dtype=jnp.float32 to both
    this and actor_forward if strict parity matters.
    """
    ln = _layer_norm_f32
    x = ln(x.astype(jnp.float32))
    h = jnp.dot(x.astype(matmul_dtype), params["w1"].astype(matmul_dtype),
                preferred_element_type=jnp.float32) + params["b1"]
    h = ln(jnp.maximum(h, 0.0))
    h = jnp.dot(h.astype(matmul_dtype), params["w2"].astype(matmul_dtype),
                preferred_element_type=jnp.float32) + params["b2"]
    h = ln(jnp.maximum(h, 0.0))
    mean = jnp.tanh(jnp.dot(h.astype(matmul_dtype), params["wm"].astype(matmul_dtype),
                            preferred_element_type=jnp.float32) + params["bm"])
    std = jnp.broadcast_to(jnp.exp(jnp.clip(params["log_std"], -20.0, 2.0)), mean.shape)
    return mean, std


# --------------------------------- main ---------------------------------------

if __name__ == "__main__":
    key = jax.random.PRNGKey(0)

    batch, obs_dim, action_dim = 10, 12, 4   # batch=10 exercises the pad path
    hidden_1 = hidden_2 = 128                # module defaults

    kp, kx = jax.random.split(key)
    params = make_params(kp, obs_dim, action_dim, hidden_1, hidden_2)
    x = jax.random.normal(kx, (batch, obs_dim), jnp.float32)

    mean, std = actor_forward(x, params)
    jax.block_until_ready((mean, std))

    ref_mean, ref_std = _reference(x, params)
    assert mean.shape == (batch, action_dim) and std.shape == (batch, action_dim)
    assert jnp.allclose(mean, ref_mean, atol=2e-3, rtol=2e-3), "mean mismatch vs reference"
    assert jnp.allclose(std, ref_std, atol=1e-6), "std mismatch vs reference"
    print("KERNEL_OK")
</pallas_src>

<mosaic_0001>
module attributes {stable_mosaic.version = 11 : i64} {
  func.func @_actor_kernel(%arg0: i32, %arg1: memref<16x12xf32, #tpu.memory_space<vmem>>, %arg2: memref<12x128xbf16, #tpu.memory_space<vmem>>, %arg3: memref<1x128xf32, #tpu.memory_space<vmem>>, %arg4: memref<128x128xbf16, #tpu.memory_space<vmem>>, %arg5: memref<1x128xf32, #tpu.memory_space<vmem>>, %arg6: memref<128x4xbf16, #tpu.memory_space<vmem>>, %arg7: memref<1x4xf32, #tpu.memory_space<vmem>>, %arg8: memref<16x4xf32, #tpu.memory_space<vmem>>) attributes {dimension_semantics = [#tpu.dimension_semantics<parallel>], iteration_bounds = array<i64: 1>, scalar_prefetch = 0 : i64, scratch_operands = 0 : i64, tpu.core_type = #tpu.core_type<tc>, window_params = [{transform_indices = @transform_0, window_bounds = array<i64: 16, 12>}, {pipeline_mode = #tpu.pipeline_mode<synchronous>, transform_indices = @transform_1, window_bounds = array<i64: 12, 128>}, {pipeline_mode = #tpu.pipeline_mode<synchronous>, transform_indices = @transform_2, window_bounds = array<i64: 1, 128>}, {pipeline_mode = #tpu.pipeline_mode<synchronous>, transform_indices = @transform_3, window_bounds = array<i64: 128, 128>}, {pipeline_mode = #tpu.pipeline_mode<synchronous>, transform_indices = @transform_4, window_bounds = array<i64: 1, 128>}, {pipeline_mode = #tpu.pipeline_mode<synchronous>, transform_indices = @transform_5, window_bounds = array<i64: 128, 4>}, {pipeline_mode = #tpu.pipeline_mode<synchronous>, transform_indices = @transform_6, window_bounds = array<i64: 1, 4>}, {transform_indices = @transform_7, window_bounds = array<i64: 16, 4>}]} {
    %c0 = arith.constant 0 : index
    %c0_0 = arith.constant 0 : index
    %0 = vector.load %arg1[%c0, %c0_0] : memref<16x12xf32, #tpu.memory_space<vmem>>, vector<16x12xf32>
    %cst = arith.constant dense<0.000000e+00> : vector<16xf32>
    %1 = vector.multi_reduction <add>, %0, %cst [1] : vector<16x12xf32> to vector<16xf32>
    %2 = vector.shape_cast %1 : vector<16xf32> to vector<16x1xf32>
    %3 = arith.mulf %0, %0 : vector<16x12xf32>
    %cst_1 = arith.constant dense<0.000000e+00> : vector<16xf32>
    %4 = vector.multi_reduction <add>, %3, %cst_1 [1] : vector<16x12xf32> to vector<16xf32>
    %5 = vector.shape_cast %4 : vector<16xf32> to vector<16x1xf32>
    %cst_2 = arith.constant 0.0833333358 : f32
    %6 = vector.broadcast %cst_2 : f32 to vector<16x1xf32>
    %7 = arith.mulf %2, %6 : vector<16x1xf32>
    %cst_3 = arith.constant 0.0833333358 : f32
    %8 = vector.broadcast %cst_3 : f32 to vector<16x1xf32>
    %9 = arith.mulf %5, %8 : vector<16x1xf32>
    %10 = arith.mulf %7, %7 : vector<16x1xf32>
    %11 = arith.subf %9, %10 : vector<16x1xf32>
    %cst_4 = arith.constant 0.000000e+00 : f32
    %12 = vector.broadcast %cst_4 : f32 to vector<16x1xf32>
    %13 = arith.maximumf %11, %12 : vector<16x1xf32>
    %14 = vector.broadcast %7 : vector<16x1xf32> to vector<16x12xf32>
    %15 = arith.subf %0, %14 : vector<16x12xf32>
    %cst_5 = arith.constant 9.99999974E-6 : f32
    %16 = vector.broadcast %cst_5 : f32 to vector<16x1xf32>
    %17 = arith.addf %13, %16 : vector<16x1xf32>
    %18 = math.rsqrt %17 : vector<16x1xf32>
    %19 = vector.broadcast %18 : vector<16x1xf32> to vector<16x12xf32>
    %20 = arith.mulf %15, %19 : vector<16x12xf32>
    %21 = arith.truncf %20 : vector<16x12xf32> to vector<16x12xbf16>
    %c0_6 = arith.constant 0 : index
    %c0_7 = arith.constant 0 : index
    %22 = vector.load %arg2[%c0_6, %c0_7] : memref<12x128xbf16, #tpu.memory_space<vmem>>, vector<12x128xbf16>
    %cst_8 = arith.constant dense<0.000000e+00> : vector<16x128xf32>
    %23 = tpu.matmul %21, %22, %cst_8 {dimension_numbers = #tpu.dot_dimension_numbers<[1], [0], [0], [1], [0, 0, 1, 1], [], []>} : vector<16x12xbf16>, vector<12x128xbf16>, vector<16x128xf32> -> vector<16x128xf32>
    %c0_9 = arith.constant 0 : index
    %c0_10 = arith.constant 0 : index
    %24 = vector.load %arg3[%c0_9, %c0_10] : memref<1x128xf32, #tpu.memory_space<vmem>>, vector<1x128xf32>
    %25 = vector.broadcast %24 : vector<1x128xf32> to vector<16x128xf32>
    %26 = arith.addf %23, %25 : vector<16x128xf32>
    %cst_11 = arith.constant 0.000000e+00 : f32
    %27 = vector.broadcast %cst_11 : f32 to vector<16x128xf32>
    %28 = arith.maximumf %26, %27 : vector<16x128xf32>
    %cst_12 = arith.constant dense<0.000000e+00> : vector<16xf32>
    %29 = vector.multi_reduction <add>, %28, %cst_12 [1] : vector<16x128xf32> to vector<16xf32>
    %30 = vector.shape_cast %29 : vector<16xf32> to vector<16x1xf32>
    %31 = arith.mulf %28, %28 : vector<16x128xf32>
    %cst_13 = arith.constant dense<0.000000e+00> : vector<16xf32>
    %32 = vector.multi_reduction <add>, %31, %cst_13 [1] : vector<16x128xf32> to vector<16xf32>
    %33 = vector.shape_cast %32 : vector<16xf32> to vector<16x1xf32>
    %cst_14 = arith.constant 7.812500e-03 : f32
    %34 = vector.broadcast %cst_14 : f32 to vector<16x1xf32>
    %35 = arith.mulf %30, %34 : vector<16x1xf32>
    %cst_15 = arith.constant 7.812500e-03 : f32
    %36 = vector.broadcast %cst_15 : f32 to vector<16x1xf32>
    %37 = arith.mulf %33, %36 : vector<16x1xf32>
    %38 = arith.mulf %35, %35 : vector<16x1xf32>
    %39 = arith.subf %37, %38 : vector<16x1xf32>
    %cst_16 = arith.constant 0.000000e+00 : f32
    %40 = vector.broadcast %cst_16 : f32 to vector<16x1xf32>
    %41 = arith.maximumf %39, %40 : vector<16x1xf32>
    %42 = vector.broadcast %35 : vector<16x1xf32> to vector<16x128xf32>
    %43 = arith.subf %28, %42 : vector<16x128xf32>
    %cst_17 = arith.constant 9.99999974E-6 : f32
    %44 = vector.broadcast %cst_17 : f32 to vector<16x1xf32>
    %45 = arith.addf %41, %44 : vector<16x1xf32>
    %46 = math.rsqrt %45 : vector<16x1xf32>
    %47 = vector.broadcast %46 : vector<16x1xf32> to vector<16x128xf32>
    %48 = arith.mulf %43, %47 : vector<16x128xf32>
    %49 = arith.truncf %48 : vector<16x128xf32> to vector<16x128xbf16>
    %c0_18 = arith.constant 0 : index
    %c0_19 = arith.constant 0 : index
    %50 = vector.load %arg4[%c0_18, %c0_19] : memref<128x128xbf16, #tpu.memory_space<vmem>>, vector<128x128xbf16>
    %cst_20 = arith.constant dense<0.000000e+00> : vector<16x128xf32>
    %51 = tpu.matmul %49, %50, %cst_20 {dimension_numbers = #tpu.dot_dimension_numbers<[1], [0], [0], [1], [0, 0, 1, 1], [], []>} : vector<16x128xbf16>, vector<128x128xbf16>, vector<16x128xf32> -> vector<16x128xf32>
    %c0_21 = arith.constant 0 : index
    %c0_22 = arith.constant 0 : index
    %52 = vector.load %arg5[%c0_21, %c0_22] : memref<1x128xf32, #tpu.memory_space<vmem>>, vector<1x128xf32>
    %53 = vector.broadcast %52 : vector<1x128xf32> to vector<16x128xf32>
    %54 = arith.addf %51, %53 : vector<16x128xf32>
    %cst_23 = arith.constant 0.000000e+00 : f32
    %55 = vector.broadcast %cst_23 : f32 to vector<16x128xf32>
    %56 = arith.maximumf %54, %55 : vector<16x128xf32>
    %cst_24 = arith.constant dense<0.000000e+00> : vector<16xf32>
    %57 = vector.multi_reduction <add>, %56, %cst_24 [1] : vector<16x128xf32> to vector<16xf32>
    %58 = vector.shape_cast %57 : vector<16xf32> to vector<16x1xf32>
    %59 = arith.mulf %56, %56 : vector<16x128xf32>
    %cst_25 = arith.constant dense<0.000000e+00> : vector<16xf32>
    %60 = vector.multi_reduction <add>, %59, %cst_25 [1] : vector<16x128xf32> to vector<16xf32>
    %61 = vector.shape_cast %60 : vector<16xf32> to vector<16x1xf32>
    %cst_26 = arith.constant 7.812500e-03 : f32
    %62 = vector.broadcast %cst_26 : f32 to vector<16x1xf32>
    %63 = arith.mulf %58, %62 : vector<16x1xf32>
    %cst_27 = arith.constant 7.812500e-03 : f32
    %64 = vector.broadcast %cst_27 : f32 to vector<16x1xf32>
    %65 = arith.mulf %61, %64 : vector<16x1xf32>
    %66 = arith.mulf %63, %63 : vector<16x1xf32>
    %67 = arith.subf %65, %66 : vector<16x1xf32>
    %cst_28 = arith.constant 0.000000e+00 : f32
    %68 = vector.broadcast %cst_28 : f32 to vector<16x1xf32>
    %69 = arith.maximumf %67, %68 : vector<16x1xf32>
    %70 = vector.broadcast %63 : vector<16x1xf32> to vector<16x128xf32>
    %71 = arith.subf %56, %70 : vector<16x128xf32>
    %cst_29 = arith.constant 9.99999974E-6 : f32
    %72 = vector.broadcast %cst_29 : f32 to vector<16x1xf32>
    %73 = arith.addf %69, %72 : vector<16x1xf32>
    %74 = math.rsqrt %73 : vector<16x1xf32>
    %75 = vector.broadcast %74 : vector<16x1xf32> to vector<16x128xf32>
    %76 = arith.mulf %71, %75 : vector<16x128xf32>
    %77 = arith.truncf %76 : vector<16x128xf32> to vector<16x128xbf16>
    %c0_30 = arith.constant 0 : index
    %c0_31 = arith.constant 0 : index
    %78 = vector.load %arg6[%c0_30, %c0_31] : memref<128x4xbf16, #tpu.memory_space<vmem>>, vector<128x4xbf16>
    %cst_32 = arith.constant dense<0.000000e+00> : vector<16x4xf32>
    %79 = tpu.matmul %77, %78, %cst_32 {dimension_numbers = #tpu.dot_dimension_numbers<[1], [0], [0], [1], [0, 0, 1, 1], [], []>} : vector<16x128xbf16>, vector<128x4xbf16>, vector<16x4xf32> -> vector<16x4xf32>
    %c0_33 = arith.constant 0 : index
    %c0_34 = arith.constant 0 : index
    %80 = vector.load %arg7[%c0_33, %c0_34] : memref<1x4xf32, #tpu.memory_space<vmem>>, vector<1x4xf32>
    %81 = vector.broadcast %80 : vector<1x4xf32> to vector<16x4xf32>
    %82 = arith.addf %79, %81 : vector<16x4xf32>
    %83 = math.tanh %82 : vector<16x4xf32>
    %c0_35 = arith.constant 0 : index
    %c0_36 = arith.constant 0 : index
    %84 = vector.load %arg8[%c0_35, %c0_36] : memref<16x4xf32, #tpu.memory_space<vmem>>, vector<16x4xf32>
    tpu.vector_store %arg8[%c0_35, %c0_36], %83 {strides = array<i32>} : memref<16x4xf32, #tpu.memory_space<vmem>>, vector<16x4xf32>,
    return
  }
  func.func @transform_0(%arg0: i32) -> (i32, i32) {
    %c0_i32 = arith.constant 0 : i32
    %c0_i32_0 = arith.constant 0 : i32
    return %arg0, %c0_i32 : i32, i32
  }
  func.func @transform_1(%arg0: i32) -> (i32, i32) {
    %c0_i32 = arith.constant 0 : i32
    %c0_i32_0 = arith.constant 0 : i32
    %c0_i32_1 = arith.constant 0 : i32
    return %c0_i32, %c0_i32_0 : i32, i32
  }
  func.func @transform_2(%arg0: i32) -> (i32, i32) {
    %c0_i32 = arith.constant 0 : i32
    %c0_i32_0 = arith.constant 0 : i32
    %c0_i32_1 = arith.constant 0 : i32
    return %c0_i32, %c0_i32_0 : i32, i32
  }
  func.func @transform_3(%arg0: i32) -> (i32, i32) {
    %c0_i32 = arith.constant 0 : i32
    %c0_i32_0 = arith.constant 0 : i32
    %c0_i32_1 = arith.constant 0 : i32
    return %c0_i32, %c0_i32_0 : i32, i32
  }
  func.func @transform_4(%arg0: i32) -> (i32, i32) {
    %c0_i32 = arith.constant 0 : i32
    %c0_i32_0 = arith.constant 0 : i32
    %c0_i32_1 = arith.constant 0 : i32
    return %c0_i32, %c0_i32_0 : i32, i32
  }
  func.func @transform_5(%arg0: i32) -> (i32, i32) {
    %c0_i32 = arith.constant 0 : i32
    %c0_i32_0 = arith.constant 0 : i32
    %c0_i32_1 = arith.constant 0 : i32
    return %c0_i32, %c0_i32_0 : i32, i32
  }
  func.func @transform_6(%arg0: i32) -> (i32, i32) {
    %c0_i32 = arith.constant 0 : i32
    %c0_i32_0 = arith.constant 0 : i32
    %c0_i32_1 = arith.constant 0 : i32
    return %c0_i32, %c0_i32_0 : i32, i32
  }
  func.func @transform_7(%arg0: i32) -> (i32, i32) {
    %c0_i32 = arith.constant 0 : i32
    %c0_i32_0 = arith.constant 0 : i32
    return %arg0, %c0_i32 : i32, i32
  }
}

</mosaic_0001>

<bundles_post_ra>
// kernel: tpu_custom_call.1
= control target key start
LH: loop header
LB: loop body
LE: loop exit
PB: predicated region body
PF: predicated region fallthrough
CT: control target
= control target key end

     0   :  { %12 = vsyncpa [#allocation3], 0  ;;  %s584_s24 = smov [#allocation2]   ;;  %s735_s0 = inlined_call_operand.hbm [shape: f32[16,12], index: 0, kind: input, shape index: {}]   ;;  %s736_s1 = inlined_call_operand.vmem [shape: bf16[12,128], index: 1, kind: input, shape index: {}]   ;;  %s737_s2 = inlined_call_operand.vmem [shape: f32[1,128], index: 2, kind: input, shape index: {}]   ;;  %s738_s3 = inlined_call_operand.vmem [shape: bf16[128,128], index: 3, kind: input, shape index: {}]   ;;  %s739_s4 = inlined_call_operand.vmem [shape: f32[1,128], index: 4, kind: input, shape index: {}]   ;;  %s740_s5 = inlined_call_operand.vmem [shape: bf16[128,4], index: 5, kind: input, shape index: {}]   ;;  %s741_s6 = inlined_call_operand.vmem [shape: f32[1,4], index: 6, kind: input, shape index: {}]   ;;  %s742_s7 = inlined_call_operand.vmem [shape: f32[16,4], index: 7, kind: output, shape index: {}]  }
   0x1   :  { %s18_s25 = sshll.u32 %s584_s24, 4  ;;  %s560_s28 = scalar_lea.hbm %s735_s0, 256  ;;  %s19_s25 = int_to_ptr.vmem [resolvable:$true] %s18_s25 }
   0x2   :  { %p561_p0 = scmp.ne.s32.totalorder %s735_s0, %s560_s28  ;;  %p564_p1 = scmp.lt.u32.totalorder %s560_s28, %s735_s0 }
   0x4   :  { %p566_p2 = pnand %p564_p1, %p561_p0 }
   0x6   :  { %569 = shalt.err (!%p566_p2)
}
   0x7   :  { %s570_s10 = scalar_lea.vmem %s19_s25, 256  ;;  %p575_p4 = scmp.lt.s32.totalorder %s19_s25, %s19_s25 }
   0x8   :  { %p571_p3 = scmp.ne.s32.totalorder %s19_s25, %s570_s10  ;;  %p576_p5 = scmp.lt.s32.totalorder %s570_s10, %s570_s10 }
   0xa   :  { %p577_p6 = por %p576_p5, %p575_p4 }
   0xc   :  { %p578_p7 = pnand %p577_p6, %p571_p3 }
   0xe   :  { %581 = shalt.err (!%p578_p7)
}
   0xf   :  { %s585_s11 = smov 128   ;;  %s586_s12 = smov 8  }
  0x10   :  { %24 = dma.hbm_to_vmem [thread:$0]  %s735_s0, 256, %s19_s25, [#allocation3], %s585_s11, %s585_s11, %s586_s12  }
  0x11   :  { %582 = dma.done.wait [#allocation3], 256  }
  0x12   :  { %583 = vsyncadd [#allocation3], 4294967040  ;;  %vm43_vm0 = vcmask 97280   ;;  %v41_v0 = vld [vmem:[#allocation2] sm:$0xff]  ;;  %v42_v1 = vld [vmem:[#allocation2 + $0x8] sm:$0xff]  ;;  %vm94_vm1 = vcmask 1045504  }
  0x13   :  { %v44_v2 = vsel %vm43_vm0, %v41_v0, 0.0  ;;  %v50_v3 = vmul.f32 %v41_v0, %v41_v0  ;;  %v47_v4 = vsel %vm43_vm0, %v42_v1, 0.0  ;;  %v51_v5 = vmul.f32 %v42_v1, %v42_v1  ;;  %v527_v8 = vld [vmem:[%s736_s1] sm:$0x3f]   ;;  %v529_v46 = vld [vmem:[%s738_s3 + $0x8] sm:$0xff]   ;;  %v530_v47 = vld [vmem:[%s738_s3 + $0x10] sm:$0xff]  }
  0x14   :  { %45 = vadd.xlane.f32.xlu0 %v44_v2  ;;  %v587_v9 = vmov 0.0   ;;  %vm588_vm2 = vmmov 0   ;;  %v96_v10 = vsel %vm94_vm1, %v527_v8, 0  ;;  %v528_v34 = vld [vmem:[%s738_s3] sm:$0xff]   ;;  %v531_v48 = vld [vmem:[%s738_s3 + $0x18] sm:$0xff]   ;;  %v533_v50 = vld [vmem:[%s738_s3 + $0x28] sm:$0xff]  }
  0x15   :  { %v52_v6 = vsel %vm43_vm0, %v50_v3, 0.0  ;;  %v55_v7 = vsel %vm43_vm0, %v51_v5, 0.0  ;;  %476 = vmatprep.subr.bf16.mxu0 %v587_v9  ;;  %478 = vmatprep.mubr.msk.bf16.mxu0 %vm588_vm2, %v587_v9  ;;  %v435_v35 = vld [vmem:[%s737_s2] ss:$0 sm:$0xff]  ;;  %v534_v51 = vld [vmem:[%s738_s3 + $0x30] sm:$0xff]   ;;  %v535_v52 = vld [vmem:[%s738_s3 + $0x38] sm:$0xff]  }
  0x16   :  { %53 = vadd.xlane.f32.xlu1 %v52_v6  ;;  %482 = vmatprep.subr.bf16.mxu1 %v587_v9  ;;  %v532_v49 = vld [vmem:[%s738_s3 + $0x20] sm:$0xff]   ;;  %vm427_vm3 = vcmask 31744  }
  0x17   :  { %498 = vmatprep.mubr.msk.bf16.mxu1 %vm588_vm2, %v587_v9  ;;  %477 = vmatpush3.bf16.msra.mxu0 %v96_v10 }
  0x18   :  { %48 = vadd.xlane.f32.xlu0 %v47_v4  ;;  %502 = vmatprep.subr.bf16.mxu0 %v587_v9 }
  0x19   :  { %483 = vmatpush3.bf16.msra.mxu1 %v528_v34 }
  0x1a   :  { %56 = vadd.xlane.f32.xlu1 %v55_v7  ;;  %484 = vmatprep.subr.bf16.mxu1 %v587_v9 }
  0x1d   :  { %485 = vmatpush3.bf16.msra.mxu1 %v529_v46 }
  0x1e   :  { %486 = vmatprep.subr.bf16.mxu1 %v587_v9 }
  0x21   :  { %487 = vmatpush3.bf16.msra.mxu1 %v530_v47 }
  0x22   :  { %488 = vmatprep.subr.bf16.mxu1 %v587_v9 }
  0x25   :  { %489 = vmatpush3.bf16.msra.mxu1 %v531_v48 }
  0x26   :  { %490 = vmatprep.subr.bf16.mxu1 %v587_v9 }
  0x29   :  { %491 = vmatpush3.bf16.msra.mxu1 %v532_v49 }
  0x2a   :  { %492 = vmatprep.subr.bf16.mxu1 %v587_v9 }
  0x2d   :  { %493 = vmatpush3.bf16.msra.mxu1 %v533_v50 }
  0x2e   :  { %494 = vmatprep.subr.bf16.mxu1 %v587_v9 }
  0x31   :  { %495 = vmatpush3.bf16.msra.mxu1 %v534_v51 }
  0x32   :  { %496 = vmatprep.subr.bf16.mxu1 %v587_v9 }
  0x35   :  { %497 = vmatpush3.bf16.msra.mxu1 %v535_v52 }
  0xa1   :  { %v46_v11 = vpop.xlane.xlu0 %45 }
  0xa2   :  { %v58_v12 = vmul.f32 0.083333336, %v46_v11 }
  0xa3   :  { %v54_v13 = vpop.xlane.xlu1 %53 }
  0xa4   :  { %v62_v14 = vmul.f32 %v58_v12, %v58_v12  ;;  %v60_v15 = vmul.f32 0.083333336, %v54_v13  ;;  %v68_v28 = vsub.f32 %v41_v0, %v58_v12  ;;  %v536_v13 = vld [vmem:[%s740_s5] sm:$0xff]  }
  0xa5   :  { %v49_v16 = vpop.xlane.xlu0 %48 }
  0xa6   :  { %v64_v17 = vsub.f32 %v60_v15, %v62_v14  ;;  %v59_v18 = vmul.f32 0.083333336, %v49_v16  ;;  %v438_v14 = vld [vmem:[%s739_s4] ss:$0 sm:$0xff] }
  0xa7   :  { %v57_v19 = vpop.xlane.xlu1 %56 }
  0xa8   :  { %v66_v20 = vmax.f32 %v64_v17, 0.0  ;;  %v63_v21 = vmul.f32 %v59_v18, %v59_v18  ;;  %v61_v22 = vmul.f32 0.083333336, %v57_v19  ;;  %v69_v29 = vsub.f32 %v42_v1, %v59_v18 }
  0xaa   :  { %v70_v23 = vadd.f32 1e-05, %v66_v20  ;;  %v65_v24 = vsub.f32 %v61_v22, %v63_v21 }
  0xac   :  { %v67_v25 = vmax.f32 %v65_v24, 0.0  ;;  %544 = vrsqrt.f32 %v70_v23 }
  0xae   :  { %v71_v26 = vadd.f32 1e-05, %v67_v25  ;;  %v537_v25 = vld [vmem:[%s740_s5 + $0x8] sm:$0xff]  }
  0xb0   :  { %546 = vrsqrt.f32 %v71_v26  ;;  %v538_v26 = vld [vmem:[%s740_s5 + $0x10] sm:$0xff]  }
  0xb6   :  { %v545_v27 = vpop.eup %544 }
  0xb7   :  { %v74_v31 = vmul.f32 %v545_v27, %v68_v28  ;;  %v539_v27 = vld [vmem:[%s740_s5 + $0x18] sm:$0xff]   ;;  %v540_v28 = vld [vmem:[%s740_s5 + $0x20] sm:$0xff]  }
  0xba   :  { %v547_v30 = vpop.eup %546 }
  0xbb   :  { %v75_v32 = vmul.f32 %v547_v30, %v69_v29  ;;  %v541_v29 = vld [vmem:[%s740_s5 + $0x28] sm:$0xff]   ;;  %v542_v30 = vld [vmem:[%s740_s5 + $0x30] sm:$0xff]  }
  0xbd   :  { %v76_v33 = vpack.c.bf16 %v75_v32, %v74_v31  ;;  %v543_v31 = vld [vmem:[%s740_s5 + $0x38] sm:$0xff]  }
  0xbf   :  { %479 = vmatmul.mubr.msk.bf16.vlgmr.msra.gmra.mrb[0].mxu0 %vm43_vm0, %v76_v33 }
  0xc0   :  { %518 = vmatprep.mubr.msk.bf16.mxu0 %vm588_vm2, %v587_v9  ;;  %503 = vmatpush3.bf16.msra.mxu0 %v536_v13 }
  0xc1   :  { %504 = vmatprep.subr.bf16.mxu0 %v587_v9 }
  0xc4   :  { %505 = vmatpush3.bf16.msra.mxu0 %v537_v25 }
  0xc5   :  { %506 = vmatprep.subr.bf16.mxu0 %v587_v9 }
  0xc8   :  { %507 = vmatpush3.bf16.msra.mxu0 %v538_v26 }
  0xc9   :  { %508 = vmatprep.subr.bf16.mxu0 %v587_v9 }
  0xcc   :  { %509 = vmatpush3.bf16.msra.mxu0 %v539_v27 }
  0xcd   :  { %510 = vmatprep.subr.bf16.mxu0 %v587_v9 }
  0xd0   :  { %511 = vmatpush3.bf16.msra.mxu0 %v540_v28 }
  0xd1   :  { %512 = vmatprep.subr.bf16.mxu0 %v587_v9 }
  0xd4   :  { %513 = vmatpush3.bf16.msra.mxu0 %v541_v29 }
  0xd5   :  { %514 = vmatprep.subr.bf16.mxu0 %v587_v9 }
  0xd8   :  { %515 = vmatpush3.bf16.msra.mxu0 %v542_v30 }
  0xd9   :  { %516 = vmatprep.subr.bf16.mxu0 %v587_v9 }
  0xdc   :  { %517 = vmatpush3.bf16.msra.mxu0 %v543_v31 }
 0x192   :  { %v132_v36 = vpop.f32.mrb[0].mxu0 }
 0x193   :  { %v133_v37 = vadd.f32 %v435_v35, %v132_v36  ;;  %v480_v38 = vpop.f32.mrb[1].mxu0 }
 0x194   :  { %v135_v39 = vpop.f32.mrb[2].mxu0 }
 0x195   :  { %v139_v40 = vmax.f32 %v133_v37, 0.0  ;;  %v136_v41 = vadd.f32 %v435_v35, %v135_v39  ;;  %v481_v42 = vpop.f32.mrb[3].mxu0 }
 0x197   :  { %v140_v43 = vmax.f32 %v136_v41, 0.0  ;;  %141 = vadd.xlane.f32.xlu0 %v139_v40  ;;  %v145_v44 = vmul.f32 %v139_v40, %v139_v40 }
 0x199   :  { %143 = vadd.xlane.f32.xlu1 %v140_v43  ;;  %v146_v45 = vmul.f32 %v140_v43, %v140_v43 }
 0x19b   :  { %147 = vadd.xlane.f32.xlu0 %v145_v44 }
 0x19d   :  { %149 = vadd.xlane.f32.xlu1 %v146_v45 }
 0x224   :  { %v142_v53 = vpop.xlane.xlu0 %141 }
 0x225   :  { %v151_v54 = vmul.f32 0.0078125, %v142_v53 }
 0x226   :  { %v144_v55 = vpop.xlane.xlu1 %143 }
 0x227   :  { %v152_v56 = vmul.f32 0.0078125, %v144_v55  ;;  %v155_v58 = vmul.f32 %v151_v54, %v151_v54  ;;  %v161_v6 = vsub.f32 %v139_v40, %v151_v54  ;;  %v447_v54 = vld [vmem:[%s741_s6] ss:$0 sm:$0xff] }
 0x228   :  { %v148_v57 = vpop.xlane.xlu0 %147 }
 0x229   :  { %v153_v59 = vmul.f32 0.0078125, %v148_v57  ;;  %v156_v61 = vmul.f32 %v152_v56, %v152_v56  ;;  %v162_v7 = vsub.f32 %v140_v43, %v152_v56 }
 0x22a   :  { %v150_v60 = vpop.xlane.xlu1 %149 }
 0x22b   :  { %v157_v62 = vsub.f32 %v153_v59, %v155_v58  ;;  %v154_v63 = vmul.f32 0.0078125, %v150_v60 }
 0x22d   :  { %v159_v0 = vmax.f32 %v157_v62, 0.0  ;;  %v158_v1 = vsub.f32 %v154_v63, %v156_v61 }
 0x22f   :  { %v163_v2 = vadd.f32 1e-05, %v159_v0  ;;  %v160_v3 = vmax.f32 %v158_v1, 0.0 }
 0x231   :  { %548 = vrsqrt.f32 %v163_v2  ;;  %v164_v4 = vadd.f32 1e-05, %v160_v3 }
 0x233   :  { %550 = vrsqrt.f32 %v164_v4 }
 0x23b   :  { %v549_v5 = vpop.eup %548 }
 0x23c   :  { %v167_v10 = vmul.f32 %v549_v5, %v161_v6 }
 0x23d   :  { %v551_v8 = vpop.eup %550 }
 0x23e   :  { %v168_v11 = vmul.f32 %v551_v8, %v162_v7 }
 0x240   :  { %v169_v12 = vpack.c.bf16 %v168_v11, %v167_v10 }
 0x242   :  { %499 = vmatmul.mubr.bf16.vlgmr.msra.gmra.mrb[0].mxu1 %v169_v12 }
 0x315   :  { %v275_v15 = vpop.f32.mrb[0].mxu1 }
 0x316   :  { %v276_v16 = vadd.f32 %v438_v14, %v275_v15  ;;  %v500_v17 = vpop.f32.mrb[1].mxu1 }
 0x317   :  { %v278_v18 = vpop.f32.mrb[2].mxu1 }
 0x318   :  { %v282_v19 = vmax.f32 %v276_v16, 0.0  ;;  %v279_v20 = vadd.f32 %v438_v14, %v278_v18  ;;  %v501_v21 = vpop.f32.mrb[3].mxu1 }
 0x31a   :  { %v283_v22 = vmax.f32 %v279_v20, 0.0  ;;  %284 = vadd.xlane.f32.xlu0 %v282_v19  ;;  %v288_v23 = vmul.f32 %v282_v19, %v282_v19 }
 0x31c   :  { %286 = vadd.xlane.f32.xlu1 %v283_v22  ;;  %v289_v24 = vmul.f32 %v283_v22, %v283_v22 }
 0x31e   :  { %290 = vadd.xlane.f32.xlu0 %v288_v23 }
 0x320   :  { %292 = vadd.xlane.f32.xlu1 %v289_v24 }
 0x3a7   :  { %v285_v32 = vpop.xlane.xlu0 %284 }
 0x3a8   :  { %v294_v33 = vmul.f32 0.0078125, %v285_v32 }
 0x3a9   :  { %v287_v34 = vpop.xlane.xlu1 %286 }
 0x3aa   :  { %v295_v35 = vmul.f32 0.0078125, %v287_v34  ;;  %v298_v37 = vmul.f32 %v294_v33, %v294_v33  ;;  %v304_v48 = vsub.f32 %v282_v19, %v294_v33 }
 0x3ab   :  { %v291_v36 = vpop.xlane.xlu0 %290 }
 0x3ac   :  { %v296_v38 = vmul.f32 0.0078125, %v291_v36  ;;  %v299_v40 = vmul.f32 %v295_v35, %v295_v35  ;;  %v305_v49 = vsub.f32 %v283_v22, %v295_v35 }
 0x3ad   :  { %v293_v39 = vpop.xlane.xlu1 %292 }
 0x3ae   :  { %v300_v41 = vsub.f32 %v296_v38, %v298_v37  ;;  %v297_v42 = vmul.f32 0.0078125, %v293_v39 }
 0x3b0   :  { %v302_v43 = vmax.f32 %v300_v41, 0.0  ;;  %v301_v44 = vsub.f32 %v297_v42, %v299_v40 }
 0x3b2   :  { %v306_v45 = vadd.f32 1e-05, %v302_v43  ;;  %v303_v46 = vmax.f32 %v301_v44, 0.0 }
 0x3b4   :  { %552 = vrsqrt.f32 %v306_v45  ;;  %v307_v47 = vadd.f32 1e-05, %v303_v46 }
 0x3b6   :  { %554 = vrsqrt.f32 %v307_v47 }
 0x3be   :  { %v553_v9 = vpop.eup %552 }
 0x3bf   :  { %v310_v51 = vmul.f32 %v553_v9, %v304_v48 }
 0x3c0   :  { %v555_v50 = vpop.eup %554 }
 0x3c1   :  { %v311_v52 = vmul.f32 %v555_v50, %v305_v49 }
 0x3c3   :  { %v312_v53 = vpack.c.bf16 %v311_v52, %v310_v51 }
 0x3c5   :  { %519 = vmatmul.mubr.bf16.vlgmr.msra.gmra.mrb[4].mxu0 %v312_v53 }
 0x498   :  { %v418_v55 = vpop.f32.mrb[4].mxu0 }
 0x499   :  { %v419_v56 = vadd.f32 %v447_v54, %v418_v55  ;;  %v520_v57 = vpop.f32.mrb[5].mxu0 }
 0x49a   :  { %v421_v58 = vpop.f32.mrb[6].mxu0 }
 0x49b   :  { %556 = vtanh.f32 %v419_v56  ;;  %v422_v59 = vadd.f32 %v447_v54, %v421_v58  ;;  %v521_v60 = vpop.f32.mrb[7].mxu0 }
 0x49d   :  { %558 = vtanh.f32 %v422_v59 }
 0x4a5   :  { %v557_v61 = vpop.eup %556 }
 0x4a6   :  { %428 = vst.msk [vmem:[%s742_s7] sm:$0xff] %vm427_vm3, %v557_v61 }
 0x4a7   :  { %v559_v62 = vpop.eup %558 }
 0x4a8   :  { %429 = vst.msk [vmem:[%s742_s7 + $0x8] sm:$0xff] %vm427_vm3, %v559_v62 }
 0x4a9   :  { %434 = vsyncpa [#allocation3], 1 }

</bundles_post_ra>
